<compile_context>
chip_gen: v5e
topology: v5e:2x2
jax: 0.10.0
libtpu: 0.0.40
codegen_flags: <defaults>
</compile_context>

<pallas_src>
import jax
import jax.numpy as jnp
from jax.experimental import pallas as pl
from jax.experimental.pallas import tpu as pltpu


def _round_up(x, m):
    return (x + m - 1) // m * m


def _make_kernel(n_layers):
    """Kernel for an MLP with `n_layers` Linear layers (torch (out,in) weights)."""

    def kernel(*refs):
        # refs = (x, idx, w0, b0, w1, b1, ..., w_{L-1}, b_{L-1}, out)
        x_ref = refs[0]          # (TB, input_dim) bf16
        idx_ref = refs[1]        # (1, TB) int32, lane-dense
        out_ref = refs[-1]       # (1, TB) f32, lane-dense
        param_refs = refs[2:-1]

        # ---- Layer 0: contract the shared `in` dim of W(out0,in) and x(TB,in).
        # This is the standard "A @ B^T" (flash-attention q·k^T) dot_general
        # pattern; result is (out0, TB): activations transposed, batch on lanes.
        x = x_ref[...]                               # bf16
        w0 = param_refs[0][...]                      # (out0, in) bf16
        b0 = param_refs[1][...]                      # (out0, 1)  f32
        h = jax.lax.dot_general(
            w0, x,
            dimension_numbers=(((1,), (1,)), ((), ())),
            preferred_element_type=jnp.float32) + b0  # (out0, TB) f32

        # ---- Remaining layers: plain (out,in) @ (in,TB) matmuls on the MXU.
        for i in range(1, n_layers):
            h = jnp.maximum(h, 0.0)                  # ReLU in f32 (v5e-safe)
            # TODO(synk): Dropout omitted (eval-mode identity); training-mode
            # masking would use pltpu.prng_seed / prng_random_bits.
            w = param_refs[2 * i][...]               # (out_i, in_i) bf16
            b = param_refs[2 * i + 1][...]           # (out_i, 1)    f32
            h = jnp.dot(w, h.astype(w.dtype),
                        preferred_element_type=jnp.float32) + b   # (out_i, TB)

        # ---- torch.gather(x, 1, idx): one-hot mask over the target (sublane)
        # axis, reduce over sublanes -> lane-dense (1, TB) result.
        # (For very large n_target, fuse the one-hot into the last matmul
        #  instead of materializing (n_target, TB) logits.)
        idx = idx_ref[...]                                        # (1, TB)
        rows = jax.lax.broadcasted_iota(jnp.int32, h.shape, 0)    # (n_target, TB)
        sel = jnp.sum(jnp.where(rows == idx, h, 0.0),
                      axis=0, keepdims=True)                      # (1, TB)
        out_ref[...] = sel

    return kernel


def multi_target_mlp_forward(x, weights, biases, *, block_b=512):
    """Forward pass of MultiTargetMLPRegression.

    x:       (B, input_dim + 1) float32; last column holds the target index.
    weights: list of (out_i, in_i) float32 arrays (PyTorch nn.Linear layout).
    biases:  list of (out_i,) float32 arrays.
    Returns  (B,) float32.
    """
    B = x.shape[0]
    input_dim = x.shape[1] - 1
    n_layers = len(weights)

    # Batch tile: multiple of 128 so the lane-dense idx/out blocks are full
    # 128-lane vregs; pad the batch up to a whole number of tiles.
    TB = _round_up(min(block_b, _round_up(B, 128)), 128)
    Bp = _round_up(B, TB)
    num_tiles = Bp // TB

    # bf16 feature stream (halves the dominant HBM read at large B); int32
    # indices (no float-encoding of indices; matches .long() truncation).
    x_feat = x[:, :-1].astype(jnp.bfloat16)              # (B, input_dim)
    idx = x[:, -1].astype(jnp.int32)                     # (B,)
    if Bp != B:
        x_feat = jnp.pad(x_feat, ((0, Bp - B), (0, 0)))
        idx = jnp.pad(idx, (0, Bp - B))
    idx2d = idx.reshape(1, Bp)                           # lane-dense

    # Interleave params: w0, b0, w1, b1, ... ; weights bf16, biases f32 (out,1).
    params, param_specs = [], []
    for w, b in zip(weights, biases):
        wb = w.astype(jnp.bfloat16)                      # (out, in)
        bb = b.astype(jnp.float32).reshape(-1, 1)        # (out, 1)
        params += [wb, bb]
        # Constant index maps -> params DMA'd once, VMEM-resident across tiles.
        param_specs += [pl.BlockSpec(wb.shape, lambda i: (0, 0)),
                        pl.BlockSpec(bb.shape, lambda i: (0, 0))]

    in_specs = ([pl.BlockSpec((TB, input_dim), lambda i: (i, 0)),
                 pl.BlockSpec((1, TB), lambda i: (0, i))]
                + param_specs)
    out_specs = pl.BlockSpec((1, TB), lambda i: (0, i))

    # VMEM budget: double-buffered x/idx/out tiles + resident params +
    # transposed f32 activations, with headroom; clamped to a safe ceiling.
    act_w = max([input_dim] + [w.shape[0] for w in weights])
    param_bytes = sum(p.size * p.dtype.itemsize for p in params)
    est = (2 * TB * (2 * input_dim + 4 + 4)              # x(bf16)+idx(i32)+out(f32), 2-deep
           + 8 * TB * act_w * 4                          # activation headroom
           + param_bytes)
    vmem_limit = int(min(32 << 20, max(8 << 20, 2 * est)))

    # Advisory cost hint so XLA schedules neighbours sensibly around the call.
    flops = 2 * Bp * sum(w.shape[0] * w.shape[1] for w in weights)
    bytes_accessed = (x_feat.size * 2 + idx2d.size * 4 + Bp * 4
                      + num_tiles * param_bytes)
    cost = pl.CostEstimate(flops=flops, transcendentals=0,
                           bytes_accessed=bytes_accessed)

    out = pl.pallas_call(
        _make_kernel(n_layers),
        out_shape=jax.ShapeDtypeStruct((1, Bp), jnp.float32),
        grid=(num_tiles,),
        in_specs=in_specs,
        out_specs=out_specs,
        compiler_params=pltpu.CompilerParams(
            dimension_semantics=("parallel",),            # independent batch tiles
            vmem_limit_bytes=vmem_limit),
        cost_estimate=cost,
    )(x_feat, idx2d, *params)

    return out.reshape(-1)[:B]                           # .flatten(), drop padding


def init_params(key, input_dim, hidden_dims, n_target):
    """PyTorch-style uniform(+-1/sqrt(fan_in)) init; torch (out, in) layout."""
    dims = [input_dim] + list(hidden_dims) + [n_target]
    weights, biases = [], []
    for i in range(len(dims) - 1):
        fan_in, fan_out = dims[i], dims[i + 1]
        key, kw, kb = jax.random.split(key, 3)
        bound = 1.0 / jnp.sqrt(fan_in)
        weights.append(jax.random.uniform(
            kw, (fan_out, fan_in), jnp.float32, -bound, bound))
        biases.append(jax.random.uniform(
            kb, (fan_out,), jnp.float32, -bound, bound))
    return weights, biases


if __name__ == "__main__":
    # Small config consistent with MultiTargetMLPRegression(input_dim,
    # hidden_dims, dropout, n_target); dropout inactive at inference.
    B = 300                      # not a tile multiple -> exercises padding
    input_dim = 24
    hidden_dims = [64, 32]
    n_target = 4

    key = jax.random.PRNGKey(0)
    key, kx, ki, kp = jax.random.split(key, 4)

    feats = jax.random.normal(kx, (B, input_dim), jnp.float32)
    tgt = jax.random.randint(ki, (B,), 0, n_target)
    x = jnp.concatenate([feats, tgt.astype(jnp.float32)[:, None]], axis=1)

    weights, biases = init_params(kp, input_dim, hidden_dims, n_target)

    out = multi_target_mlp_forward(x, weights, biases, block_b=128)
    out = jax.block_until_ready(out)

    # Pure-JAX f32 reference (torch semantics: h @ W.T + b, ReLU between,
    # gather of the per-row target column, flatten).
    h = feats
    for i, (w, b) in enumerate(zip(weights, biases)):
        h = h @ w.T + b
        if i < len(weights) - 1:
            h = jnp.maximum(h, 0.0)
    ref = h[jnp.arange(B), tgt]

    assert out.shape == (B,), out.shape
    assert jnp.allclose(out, ref, atol=5e-2, rtol=5e-2), (out, ref)

    print("KERNEL_OK")
</pallas_src>

<mosaic_0001>
module attributes {stable_mosaic.version = 11 : i64} {
  func.func @kernel(%arg0: i32, %arg1: memref<128x24xbf16, #tpu.memory_space<vmem>>, %arg2: memref<1x128xi32, #tpu.memory_space<vmem>>, %arg3: memref<64x24xbf16, #tpu.memory_space<vmem>>, %arg4: memref<64x1xf32, #tpu.memory_space<vmem>>, %arg5: memref<32x64xbf16, #tpu.memory_space<vmem>>, %arg6: memref<32x1xf32, #tpu.memory_space<vmem>>, %arg7: memref<4x32xbf16, #tpu.memory_space<vmem>>, %arg8: memref<4x1xf32, #tpu.memory_space<vmem>>, %arg9: memref<1x128xf32, #tpu.memory_space<vmem>>) attributes {dimension_semantics = [#tpu.dimension_semantics<parallel>], iteration_bounds = array<i64: 3>, scalar_prefetch = 0 : i64, scratch_operands = 0 : i64, tpu.core_type = #tpu.core_type<tc>, window_params = [{transform_indices = @transform_0, window_bounds = array<i64: 128, 24>}, {transform_indices = @transform_1, window_bounds = array<i64: 1, 128>}, {pipeline_mode = #tpu.pipeline_mode<synchronous>, transform_indices = @transform_2, window_bounds = array<i64: 64, 24>}, {pipeline_mode = #tpu.pipeline_mode<synchronous>, transform_indices = @transform_3, window_bounds = array<i64: 64, 1>}, {pipeline_mode = #tpu.pipeline_mode<synchronous>, transform_indices = @transform_4, window_bounds = array<i64: 32, 64>}, {pipeline_mode = #tpu.pipeline_mode<synchronous>, transform_indices = @transform_5, window_bounds = array<i64: 32, 1>}, {pipeline_mode = #tpu.pipeline_mode<synchronous>, transform_indices = @transform_6, window_bounds = array<i64: 4, 32>}, {pipeline_mode = #tpu.pipeline_mode<synchronous>, transform_indices = @transform_7, window_bounds = array<i64: 4, 1>}, {transform_indices = @transform_8, window_bounds = array<i64: 1, 128>}]} {
    %c0 = arith.constant 0 : index
    %c0_0 = arith.constant 0 : index
    %0 = vector.load %arg1[%c0, %c0_0] : memref<128x24xbf16, #tpu.memory_space<vmem>>, vector<128x24xbf16>
    %c0_1 = arith.constant 0 : index
    %c0_2 = arith.constant 0 : index
    %1 = vector.load %arg3[%c0_1, %c0_2] : memref<64x24xbf16, #tpu.memory_space<vmem>>, vector<64x24xbf16>
    %c0_3 = arith.constant 0 : index
    %c0_4 = arith.constant 0 : index
    %2 = vector.load %arg4[%c0_3, %c0_4] : memref<64x1xf32, #tpu.memory_space<vmem>>, vector<64x1xf32>
    %cst = arith.constant dense<0.000000e+00> : vector<64x128xf32>
    %3 = tpu.matmul %1, %0, %cst {dimension_numbers = #tpu.dot_dimension_numbers<[1], [1], [0], [0], [0, 0, 1, 0], [], []>} : vector<64x24xbf16>, vector<128x24xbf16>, vector<64x128xf32> -> vector<64x128xf32>
    %4 = vector.broadcast %2 : vector<64x1xf32> to vector<64x128xf32>
    %5 = arith.addf %3, %4 : vector<64x128xf32>
    %cst_5 = arith.constant 0.000000e+00 : f32
    %6 = vector.broadcast %cst_5 : f32 to vector<64x128xf32>
    %7 = arith.maximumf %5, %6 : vector<64x128xf32>
    %c0_6 = arith.constant 0 : index
    %c0_7 = arith.constant 0 : index
    %8 = vector.load %arg5[%c0_6, %c0_7] : memref<32x64xbf16, #tpu.memory_space<vmem>>, vector<32x64xbf16>
    %c0_8 = arith.constant 0 : index
    %c0_9 = arith.constant 0 : index
    %9 = vector.load %arg6[%c0_8, %c0_9] : memref<32x1xf32, #tpu.memory_space<vmem>>, vector<32x1xf32>
    %10 = arith.truncf %7 : vector<64x128xf32> to vector<64x128xbf16>
    %cst_10 = arith.constant dense<0.000000e+00> : vector<32x128xf32>
    %11 = tpu.matmul %8, %10, %cst_10 {dimension_numbers = #tpu.dot_dimension_numbers<[1], [0], [0], [1], [0, 0, 1, 1], [], []>} : vector<32x64xbf16>, vector<64x128xbf16>, vector<32x128xf32> -> vector<32x128xf32>
    %12 = vector.broadcast %9 : vector<32x1xf32> to vector<32x128xf32>
    %13 = arith.addf %11, %12 : vector<32x128xf32>
    %cst_11 = arith.constant 0.000000e+00 : f32
    %14 = vector.broadcast %cst_11 : f32 to vector<32x128xf32>
    %15 = arith.maximumf %13, %14 : vector<32x128xf32>
    %c0_12 = arith.constant 0 : index
    %c0_13 = arith.constant 0 : index
    %16 = vector.load %arg7[%c0_12, %c0_13] : memref<4x32xbf16, #tpu.memory_space<vmem>>, vector<4x32xbf16>
    %c0_14 = arith.constant 0 : index
    %c0_15 = arith.constant 0 : index
    %17 = vector.load %arg8[%c0_14, %c0_15] : memref<4x1xf32, #tpu.memory_space<vmem>>, vector<4x1xf32>
    %18 = arith.truncf %15 : vector<32x128xf32> to vector<32x128xbf16>
    %cst_16 = arith.constant dense<0.000000e+00> : vector<4x128xf32>
    %19 = tpu.matmul %16, %18, %cst_16 {dimension_numbers = #tpu.dot_dimension_numbers<[1], [0], [0], [1], [0, 0, 1, 1], [], []>} : vector<4x32xbf16>, vector<32x128xbf16>, vector<4x128xf32> -> vector<4x128xf32>
    %20 = vector.broadcast %17 : vector<4x1xf32> to vector<4x128xf32>
    %21 = arith.addf %19, %20 : vector<4x128xf32>
    %c0_17 = arith.constant 0 : index
    %c0_18 = arith.constant 0 : index
    %22 = vector.load %arg2[%c0_17, %c0_18] : memref<1x128xi32, #tpu.memory_space<vmem>>, vector<1x128xi32>
    %23 = tpu.iota {dimensions = array<i32: 0>} : vector<4x128xi32>
    %24 = vector.broadcast %22 : vector<1x128xi32> to vector<4x128xi32>
    %25 = arith.cmpi eq, %23, %24 : vector<4x128xi32>
    %cst_19 = arith.constant 0.000000e+00 : f32
    %26 = vector.broadcast %cst_19 : f32 to vector<4x128xf32>
    %27 = arith.select %25, %21, %26 : vector<4x128xi1>, vector<4x128xf32>
    %cst_20 = arith.constant dense<0.000000e+00> : vector<128xf32>
    %28 = vector.multi_reduction <add>, %27, %cst_20 [0] : vector<4x128xf32> to vector<128xf32>
    %29 = vector.shape_cast %28 : vector<128xf32> to vector<1x128xf32>
    %c0_21 = arith.constant 0 : index
    %c0_22 = arith.constant 0 : index
    %30 = vector.load %arg9[%c0_21, %c0_22] : memref<1x128xf32, #tpu.memory_space<vmem>>, vector<1x128xf32>
    tpu.vector_store %arg9[%c0_21, %c0_22], %29 {strides = array<i32>} : memref<1x128xf32, #tpu.memory_space<vmem>>, vector<1x128xf32>,
    return
  }
  func.func @transform_0(%arg0: i32) -> (i32, i32) {
    %c0_i32 = arith.constant 0 : i32
    %c0_i32_0 = arith.constant 0 : i32
    return %arg0, %c0_i32 : i32, i32
  }
  func.func @transform_1(%arg0: i32) -> (i32, i32) {
    %c0_i32 = arith.constant 0 : i32
    %c0_i32_0 = arith.constant 0 : i32
    return %c0_i32, %arg0 : i32, i32
  }
  func.func @transform_2(%arg0: i32) -> (i32, i32) {
    %c0_i32 = arith.constant 0 : i32
    %c0_i32_0 = arith.constant 0 : i32
    %c0_i32_1 = arith.constant 0 : i32
    return %c0_i32, %c0_i32_0 : i32, i32
  }
  func.func @transform_3(%arg0: i32) -> (i32, i32) {
    %c0_i32 = arith.constant 0 : i32
    %c0_i32_0 = arith.constant 0 : i32
    %c0_i32_1 = arith.constant 0 : i32
    return %c0_i32, %c0_i32_0 : i32, i32
  }
  func.func @transform_4(%arg0: i32) -> (i32, i32) {
    %c0_i32 = arith.constant 0 : i32
    %c0_i32_0 = arith.constant 0 : i32
    %c0_i32_1 = arith.constant 0 : i32
    return %c0_i32, %c0_i32_0 : i32, i32
  }
  func.func @transform_5(%arg0: i32) -> (i32, i32) {
    %c0_i32 = arith.constant 0 : i32
    %c0_i32_0 = arith.constant 0 : i32
    %c0_i32_1 = arith.constant 0 : i32
    return %c0_i32, %c0_i32_0 : i32, i32
  }
  func.func @transform_6(%arg0: i32) -> (i32, i32) {
    %c0_i32 = arith.constant 0 : i32
    %c0_i32_0 = arith.constant 0 : i32
    %c0_i32_1 = arith.constant 0 : i32
    return %c0_i32, %c0_i32_0 : i32, i32
  }
  func.func @transform_7(%arg0: i32) -> (i32, i32) {
    %c0_i32 = arith.constant 0 : i32
    %c0_i32_0 = arith.constant 0 : i32
    %c0_i32_1 = arith.constant 0 : i32
    return %c0_i32, %c0_i32_0 : i32, i32
  }
  func.func @transform_8(%arg0: i32) -> (i32, i32) {
    %c0_i32 = arith.constant 0 : i32
    %c0_i32_0 = arith.constant 0 : i32
    return %c0_i32, %arg0 : i32, i32
  }
}

</mosaic_0001>

<bundles_post_ra>
// kernel: tpu_custom_call.1
= control target key start
LH: loop header
LB: loop body
LE: loop exit
PB: predicated region body
PF: predicated region fallthrough
CT: control target
= control target key end

     0   :  { %13 = vsyncpa [#allocation3], 0  ;;  %s1134_s0 = inlined_call_operand.vmem [shape: bf16[384,24], index: 0, kind: input, shape index: {}]   ;;  %s1135_s1 = inlined_call_operand.vmem [shape: s32[1,384], index: 1, kind: input, shape index: {}]   ;;  %s1136_s2 = inlined_call_operand.vmem [shape: bf16[64,24], index: 2, kind: input, shape index: {}]   ;;  %s1137_s3 = inlined_call_operand.vmem [shape: f32[64,1], index: 3, kind: input, shape index: {}]   ;;  %s1138_s4 = inlined_call_operand.vmem [shape: bf16[32,64], index: 4, kind: input, shape index: {}]   ;;  %s1139_s5 = inlined_call_operand.vmem [shape: f32[32,1], index: 5, kind: input, shape index: {}]   ;;  %s1140_s6 = inlined_call_operand.vmem [shape: bf16[4,32], index: 6, kind: input, shape index: {}]   ;;  %s1141_s7 = inlined_call_operand.vmem [shape: f32[4,1], index: 7, kind: input, shape index: {}]   ;;  %s1142_s8 = inlined_call_operand.hbm [shape: f32[1,384], index: 8, kind: output, shape index: {}]  }
   0x1   :  { %15 = vsyncpa [#allocation3 + $0x1], 0  ;;  %s963_s27 = smov 0   ;;  %s965_s28 = smov 0  }
   0x2   :  { %s967_s29 = smov 0   ;;  %s969_s30 = smov 0  }
   0x3 LB: > { %s984_s9 = sadd.s32 4294967295, %s915_s30   ;;  %s716_s10 = sadd.s32 4294967294, %s915_s30   ;;  %s915_s30 = sphi %s969_s30, %s1148_s30   ;;  %s911_s29 = sphi %s967_s29, %s1147_s29   ;;  %s907_s28 = sphi %s965_s28, %s1146_s28   ;;  %s903_s27 = sphi %s963_s27, %s1145_s27  }
   0x4   : > { %s988_s11 = sadd.s32 1, %s915_s30   ;;  %s206_s12 = sadd.s32 1, %s911_s29 }
   0x5   : > { %s203_s13 = ssub.s32 %s915_s30, %s988_s11  ;;  %p216_p0 = scmp.ne.s32.totalorder %s911_s29, %s907_s28 }
   0x6   : > { %p204_p1 = scmp.eq.s32.totalorder %s203_s13, 0  ;;  %p217_p2 = scmp.eq.s32.totalorder %s984_s9, 2 }
   0x7   : > { %p222_p3 = scmp.ne.s32.totalorder %s907_s28, %s903_s27  ;;  %p223_p4 = scmp.eq.s32.totalorder %s716_s10, 2 }
   0x8   : > { %s999_s14 = scalar_select %p204_p1, %s911_s29, %s206_s12  }
   0x9   : > { %p1001_p5 = por %p217_p2, %p216_p0  ;;  %p1005_p6 = por %p223_p4, %p222_p3 }
   0xa   : > { %p719_p7 = scmp.ge.s32.totalorder %s915_s30, 1  ;;  %p274_p8 = scmp.lt.s32.totalorder %s915_s30, 4 }
   0xc   : > { %p275_p9 = pnand %p719_p7, %p274_p8 }
   0xd   : > { %s720_s17 = sshll.u32 (!%p275_p9), %s984_s9, 4  ;;  %p316_p11 = scmp.lt.s32.totalorder (!%p275_p9), %s984_s9, 2 }
   0xe   : > { %278 = sbr.rel (%p275_p9) target bundleno = 594 (0x252), region = 52  ;;  %p311_p10 = scmp.lt.s32.totalorder (!%p275_p9), %s720_s17, 47 }
   0xf   : > { %s308_s10 = sand.u32 (!%p275_p9), 1, %s907_s28  }
  0x13   : > { %s1150_s17 = smov (!%p311_p10, %s720_s17), 47  ;;  %vm452_vm0 = vcmask 195584   ;;  %v917_v11 = vmov 0   ;;  %v350_v15 = vld [vmem:[%s1137_s3 + $0x30] sm:$0xff]  ;;  %v348_v16 = vld [vmem:[%s1137_s3 + $0x20] sm:$0xff]  ;;  %v351_v19 = vld [vmem:[%s1137_s3 + $0x38] sm:$0xff] }
  0x14   : > { %s721_s18 = sshll.u32 %s1150_s17, 2  ;;  %849 = vset.pattern.permute.xlu0 %v917_v11  ;;  %850 = vset.pattern.permute.xlu1 %v917_v11  ;;  %v796_v20 = vld [vmem:[%s1136_s2 + $0x8] sm:$0xff]  ;;  %v795_v21 = vld [vmem:[%s1136_s2] sm:$0xff]  ;;  %v346_v24 = vld [vmem:[%s1137_s3 + $0x10] sm:$0xff]  ;;  %vm568_vm1 = vcmask 523264   ;;  %vm607_vm2 = vcmask 261120   ;;  %s648_s17 = scalar_lea.hbm %s1142_s8, %s984_s9 }
  0x15   : > { %s1015_s21 = scalar_lea.vmem %s1134_s0, %s721_s18  ;;  %851 = vset.pattern.permute.xlu2 %v917_v11  ;;  %384 = vperm.xlu0 %849, %v350_v15   ;;  %v344_v22 = vld [vmem:[%s1137_s3] sm:$0xff]  ;;  %v349_v23 = vld [vmem:[%s1137_s3 + $0x28] sm:$0xff]  ;;  %v347_v26 = vld [vmem:[%s1137_s3 + $0x18] sm:$0xff]  ;;  %vm630_vm4 = vcmask 1043456   ;;  %s309_s18 = scalar_lea.vmem [#allocation2], %s308_s10 }
  0x16   : > { %v794_v0 = vld [vmem:[%s1015_s21 + $0x38] sm:$0xff]  ;;  %v793_v2 = vld [vmem:[%s1015_s21 + $0x30] sm:$0xff]  ;;  %v792_v4 = vld [vmem:[%s1015_s21 + $0x28] sm:$0xff]  ;;  %374 = vperm.xlu1 %850, %v348_v16   ;;  %364 = vperm.xlu2 %851, %v346_v24   ;;  %s650_s19 = sshll.u32 %s309_s18, 4  ;;  %s652_s20 = sshll.u32 %s648_s17, 4  ;;  %s651_s19 = int_to_ptr.vmem [resolvable:$true] %s650_s19  ;;  %s653_s20 = int_to_ptr.hbm [resolvable:$true] %s652_s20 }
  0x17   : > { %v487_v1 = vsel %vm452_vm0, %v794_v0, 0  ;;  %v484_v3 = vsel %vm452_vm0, %v793_v2, 0  ;;  %v481_v5 = vsel %vm452_vm0, %v792_v4, 0  ;;  %v791_v6 = vld [vmem:[%s1015_s21 + $0x20] sm:$0xff]  ;;  %v790_v8 = vld [vmem:[%s1015_s21 + $0x18] sm:$0xff]  ;;  %v789_v10 = vld [vmem:[%s1015_s21 + $0x10] sm:$0xff] }
  0x18   : > { %801 = vmatpush.bf16.xpose.msra.mxu3 %v487_v1  ;;  %489 = vmatpush.bf16.xpose.msra.mxu0 %v487_v1  ;;  %v478_v7 = vsel %vm452_vm0, %v791_v6, 0  ;;  %v475_v9 = vsel %vm452_vm0, %v790_v8, 0  ;;  %v472_v12 = vsel %vm452_vm0, %v789_v10, 0  ;;  %v788_v13 = vld [vmem:[%s1015_s21 + $0x8] sm:$0xff]  ;;  %v787_v17 = vld [vmem:[%s1015_s21] sm:$0xff]  ;;  %v533_v27 = vld [vmem:[%s1139_s5 + $0x18] sm:$0xff] }
  0x19   : > { %v469_v14 = vsel %vm452_vm0, %v788_v13, 0  ;;  %v466_v18 = vsel %vm452_vm0, %v787_v17, 0  ;;  %v345_v25 = vld [vmem:[%s1137_s3 + $0x8] sm:$0xff]  ;;  %v797_v28 = vld [vmem:[%s1136_s2 + $0x10] sm:$0xff]  ;;  %v530_v29 = vld [vmem:[%s1139_s5] sm:$0xff]  ;;  %s317_s21 = scalar_select %p316_p11, %s984_s9, 2 }
  0x1a   : > { %v532_v30 = vld [vmem:[%s1139_s5 + $0x10] sm:$0xff]  ;;  %v599_v31 = vld [vmem:[%s1141_s7] sm:$0xf]  ;;  %v531_v32 = vld [vmem:[%s1139_s5 + $0x8] sm:$0xff]  ;;  %s867_s22 = sshra.s32 %s653_s20, 4  ;;  %s873_s9 = scalar_lea.hbm %s1142_s8, 3  ;;  %s868_s22 = int_to_ptr.hbm [resolvable:$true] %s867_s22 }
  0x1b   : > { %v798_v33 = vld [vmem:[%s1136_s2 + $0x18] sm:$0xff]  ;;  %v799_v6 = vld [vmem:[%s1138_s4] sm:$0xff]  ;;  %s318_s24 = scalar_lea.vmem %s1135_s1, %s317_s21  ;;  %s640_s21 = scalar_lea.sflag [#allocation3], %s308_s10 }
  0x1c   : > { %s869_s23 = scalar_lea.hbm %s868_s22, 1  ;;  %p874_p1 = scmp.lt.s32.totalorder %s868_s22, %s1142_s8 }
  0x1d   : > { %389 = vperm.xlu0 %849, %v351_v19   ;;  %p870_p12 = scmp.ne.s32.totalorder %s868_s22, %s869_s23  ;;  %p875_p2 = scmp.lt.s32.totalorder %s873_s9, %s869_s23 }
  0x1e   : > { %379 = vperm.xlu1 %850, %v349_v23   ;;  %369 = vperm.xlu2 %851, %v347_v26   ;;  %v598_v26 = vld [vmem:[%s1140_s6] sm:$0x3] }
  0x1f   : > { %p871_p13 = pnand %p870_p12, %p1001_p5  ;;  %p876_p3 = por %p875_p2, %p874_p1 }
  0x20   : > { %802 = vmatpush.bf16.xpose.msra.mxu3 %v484_v3  ;;  %490 = vmatpush.bf16.xpose.msra.mxu0 %v484_v3 }
  0x21   : > { %p872_p0 = pneg %p871_p13 }
  0x23   : > { %p877_p4 = pnand %p876_p3, %p872_p0 }
  0x25   : > { %354 = vperm.xlu0 %849, %v344_v22  }
  0x26   : > { %359 = vperm.xlu1 %850, %v345_v25   ;;  %550 = vperm.xlu2 %851, %v532_v30  }
  0x28   : > { %803 = vmatpush.bf16.xpose.msra.mxu3 %v481_v5  ;;  %491 = vmatpush.bf16.xpose.msra.mxu0 %v481_v5 }
  0x2d   : > { %555 = vperm.xlu0 %849, %v533_v27   ;;  %v625_v27 = vlaneseq }
  0x2e   : > { %540 = vperm.xlu1 %850, %v530_v29   ;;  %545 = vperm.xlu2 %851, %v531_v32   ;;  %v852_v29 = vld [vmem:[%s318_s24] ss:$0 sm:$0xff] }
  0x30   : > { %804 = vmatpush.bf16.xpose.msra.mxu3 %v478_v7  ;;  %492 = vmatpush.bf16.xpose.msra.mxu0 %v478_v7  ;;  %v800_v7 = vld [vmem:[%s1138_s4 + $0x8] sm:$0xff] }
  0x35   : > { %604 = vperm.xlu0 %849, %v599_v31  }
  0x38   : > { %805 = vmatpush.bf16.xpose.msra.mxu3 %v475_v9  ;;  %493 = vmatpush.bf16.xpose.msra.mxu0 %v475_v9 }
  0x40   : > { %806 = vmatpush.bf16.xpose.msra.mxu3 %v472_v12  ;;  %494 = vmatpush.bf16.xpose.msra.mxu0 %v472_v12 }
  0x48   : > { %807 = vmatpush.bf16.xpose.msra.mxu3 %v469_v14  ;;  %495 = vmatpush.bf16.xpose.msra.mxu0 %v469_v14 }
  0x50   : > { %808 = vmatpush.bf16.xpose.msra.mxu3 %v466_v18  ;;  %496 = vmatpush.bf16.xpose.msra.mxu0 %v466_v18 }
  0x57   : > { %771 = vmatmul.msk.bf16.vlgmr.msra.gmra.mxu3 %vm452_vm0, %v796_v20  ;;  %770 = vmatmul.msk.bf16.vlgmr.msra.gmra.mxu0 %vm452_vm0, %v795_v21 }
  0x67   : > { %772 = vmatmul.msk.bf16.gmra.mxu3 %vm452_vm0, %v797_v28  ;;  %v626_v28 = vshrl.u32 %v625_v27, 7 }
  0x69   : > { %vm628_vm3 = vcmp.eq.s32.totalorder %v626_v28, %v852_v29 }
  0x70   : > { %v365_v40 = vpop.permute.xlu2 %364 }
  0x77   : > { %773 = vmatmul.msk.bf16.gmra.mxu3 %vm452_vm0, %v798_v33 }
  0x78   : > { %v370_v49 = vpop.permute.xlu2 %369 }
  0x80   : > { %v551_v10 = vpop.permute.xlu2 %550 }
  0x87   : > { %v385_v38 = vpop.permute.xlu0 %384 }
  0x88   : > { %v375_v39 = vpop.permute.xlu1 %374  ;;  %v546_v14 = vpop.permute.xlu2 %545 }
  0x8f   : > { %v390_v43 = vpop.permute.xlu0 %389 }
  0x90   : > { %v380_v44 = vpop.permute.xlu1 %379 }
  0x97   : > { %v355_v59 = vpop.permute.xlu0 %354 }
  0x98   : > { %v360_v60 = vpop.permute.xlu1 %359 }
  0x9f   : > { %v556_v12 = vpop.permute.xlu0 %555 }
  0xa0   : > { %v541_v18 = vpop.permute.xlu1 %540 }
  0xa7   : > { %v605_v30 = vpop.permute.xlu0 %604 }
  0xd4   : > { %v498_v42 = vpop.f32.mrf.mxu0 }
  0xd5   : > { %v499_v62 = vadd.f32 %v498_v42, %v355_v59 }
  0xd7   : > { %v518_v2 = vmax.f32 %v499_v62, 0.0 }
  0xda   : > { %v503_v34 = vpop.f32.mrf.mxu3 }
  0xdb   : > { %v504_v57 = vadd.f32 %v503_v34, %v365_v40 }
  0xdc   : > { %v500_v56 = vpop.f32.mrf.mxu0 }
  0xdd   : > { %v501_v63 = vadd.f32 %v500_v56, %v360_v60  ;;  %v520_v1 = vmax.f32 %v504_v57, 0.0 }
  0xdf   : > { %v519_v3 = vmax.f32 %v501_v63, 0.0 }
  0xe1   : > { %v534_v5 = vpack.c.bf16 %v519_v3, %v518_v2 }
  0xe2   : > { %v505_v35 = vpop.f32.mrf.mxu3 }
  0xe3   : > { %v506_v53 = vadd.f32 %v505_v35, %v370_v49 }
  0xe5   : > { %v521_v61 = vmax.f32 %v506_v53, 0.0 }
  0xe7   : > { %v535_v4 = vpack.c.bf16 %v521_v61, %v520_v1 }
  0xea   : > { %v508_v36 = vpop.f32.mrf.mxu3 }
  0xeb   : > { %v509_v50 = vadd.f32 %v508_v36, %v375_v39 }
  0xed   : > { %v522_v58 = vmax.f32 %v509_v50, 0.0 }
  0xf2   : > { %v510_v37 = vpop.f32.mrf.mxu3 }
  0xf3   : > { %v511_v47 = vadd.f32 %v510_v37, %v380_v44 }
  0xf5   : > { %v523_v54 = vmax.f32 %v511_v47, 0.0 }
  0xf7   : > { %v536_v0 = vpack.c.bf16 %v523_v54, %v522_v58 }
  0xfa   : > { %v513_v41 = vpop.f32.mrf.mxu3 }
  0xfb   : > { %v514_v45 = vadd.f32 %v513_v41, %v385_v38 }
  0xfd   : > { %v524_v51 = vmax.f32 %v514_v45, 0.0 }
 0x102   : > { %v515_v46 = vpop.f32.mrf.mxu3 }
 0x103   : > { %v516_v48 = vadd.f32 %v515_v46, %v390_v43 }
 0x105   : > { %v525_v52 = vmax.f32 %v516_v48, 0.0 }
 0x107   : > { %v537_v55 = vpack.c.bf16 %v525_v52, %v524_v51 }
 0x109   : > { %579 = vmatpush.bf16.msra.mxu1 %v537_v55 }
 0x10d   : > { %580 = vmatpush.bf16.msra.mxu1 %v536_v0 }
 0x111   : > { %581 = vmatpush.bf16.msra.mxu1 %v535_v4 }
 0x115   : > { %582 = vmatpush.bf16.msra.mxu1 %v534_v5 }
 0x118   : > { %782 = vmatmul.msk.bf16.vlgmr.msra.gmra.mxu1 %vm568_vm1, %v799_v6 }
 0x128   : > { %783 = vmatmul.msk.bf16.gmra.mxu1 %vm568_vm1, %v800_v7 }
 0x195   : > { %v584_v8 = vpop.f32.mrf.mxu1 }
 0x196   : > { %v585_v19 = vadd.f32 %v584_v8, %v541_v18 }
 0x198   : > { %v594_v24 = vmax.f32 %v585_v19, 0.0 }
 0x19d   : > { %v586_v9 = vpop.f32.mrf.mxu1 }
 0x19e   : > { %v587_v16 = vadd.f32 %v586_v9, %v546_v14 }
 0x1a0   : > { %v595_v22 = vmax.f32 %v587_v16, 0.0 }
 0x1a2   : > { %v600_v25 = vpack.c.bf16 %v595_v22, %v594_v24 }
 0x1a5   : > { %v589_v11 = vpop.f32.mrf.mxu1 }
 0x1a6   : > { %v590_v13 = vadd.f32 %v589_v11, %v551_v10 }
 0x1a8   : > { %v596_v20 = vmax.f32 %v590_v13, 0.0 }
 0x1ad   : > { %v591_v15 = vpop.f32.mrf.mxu1 }
 0x1ae   : > { %v592_v17 = vadd.f32 %v591_v15, %v556_v12 }
 0x1b0   : > { %v597_v21 = vmax.f32 %v592_v17, 0.0 }
 0x1b2   : > { %v601_v23 = vpack.c.bf16 %v597_v21, %v596_v20 }
 0x1b4   : > { %617 = vmatpush.bf16.msra.mxu2 %v601_v23 }
 0x1b8   : > { %618 = vmatpush.bf16.msra.mxu2 %v600_v25 }
 0x1bb   : > { %784 = vmatmul.msk.bf16.vlgmr.msra.gmra.mxu2 %vm607_vm2, %v598_v26 }
 0x23e   : > { %v620_v31 = vpop.f32.mrf.mxu2 }
 0x23f   : > { %v621_v32 = vadd.f32 %v620_v31, %v605_v30 }
 0x241   : > { %v629_v33 = vsel %vm628_vm3, %v621_v32, 0.0 }
 0x242   : > { %v631_v34 = vsel %vm630_vm4, %v629_v33, 0.0 }
 0x243   : > { %v632_v35 = vrot.slane %v631_v34, 4 }
 0x245   : > { %v633_v36 = vadd.f32 %v632_v35, %v631_v34 }
 0x246   : > { %v622_v37 = vpop.f32.mrf.mxu2 }
 0x247   : > { %v634_v38 = vrot.slane %v633_v36, 2 }
 0x249   : > { %v635_v39 = vadd.f32 %v634_v38, %v633_v36 }
 0x24b   : > { %v636_v40 = vrot.slane %v635_v39, 1 }
 0x24d   : > { %v637_v41 = vadd.f32 %v636_v40, %v635_v39 }
 0x24f   : > { %638 = vst [vmem:[%s309_s18] sm:$0x1] %v637_v41 }
 0x250   : > { %880 = shalt.err (!%p877_p4)
}
 0x251   : > { %809 = dma.vmem_to_hbm [thread:$0]  (%p1001_p5), %s651_s19, 16, %s653_s20, %s640_s21  }
 0x252 PF: > { %p815_p7 = scmp.ge.s32.totalorder %s915_s30, 2  ;;  %s664_s10 = sand.u32 1, %s903_s27  }
 0x253   : > { %s665_s13 = scalar_lea.sflag [#allocation3], %s664_s10 }
 0x254   : > { %p812_p8 = pnand %p815_p7, %p1005_p6 }
 0x256   : > { %p813_p9 = pneg %p812_p8 }
 0x258   : > { %898 = dma.done.wait (%p813_p9), %s665_s13, 16  }
 0x259   : > { %900 = vsyncadd (%p813_p9), %s665_s13, 4294967280  ;;  %p18_p10 = scmp.ge.s32.totalorder %s988_s11, 5   ;;  %s1145_s27 = smov %s907_s28 }
 0x25a   : > { %s1146_s28 = smov %s911_s29  ;;  %s1147_s29 = smov %s999_s14 }
 0x25b   : > { %s1148_s30 = smov %s988_s11  ;;  %20 = sbr.rel (!%p18_p10) target bundleno = 3 (0x3), region = 90 }
 0x260   :  { %670 = vsyncpa [#allocation3], 1 }
 0x261   :  { %672 = vsyncpa [#allocation3 + $0x1], 1 }

</bundles_post_ra>
